<compile_context>
chip_gen: v6e
topology: v6e:2x2x1
jax: 0.10.0
libtpu: 0.0.40
codegen_flags: <defaults>
</compile_context>

<pallas_src>
import numpy as np
import jax
import jax.numpy as jnp
from jax import lax
from jax.experimental import pallas as pl
from jax.experimental.pallas import tpu as pltpu

_NS_ITERS = 5  # Newton-Schulz iterations used by MPNCOV (iterN=5)


def _round_up(x, m):
    return (x + m - 1) // m * m


def _pick_batch_block(b, cap=4):
    # Images per grid step: amortizes the ~0.35 us/step pipeline overhead.
    # Capped so double-buffered (bblk, C_in, Mp) input tiles stay VMEM-friendly
    # at real backbone sizes.
    for cand in range(min(cap, b), 0, -1):
        if b % cand == 0:
            return cand
    return 1


# --------------- fused features (1x1 conv + ReLU) + MPNCOV ----------------- #

def _make_feat_mpncov_kernel(bblk, m_valid, ns_iters):
    assert ns_iters >= 2

    def kernel(x_ref, w_ref, b_ref, o_ref):
        # x_ref: (bblk, C_in, Mp)   w_ref: (C, C_in)   b_ref: (C, 1)
        # o_ref: (bblk, C, C)
        w = w_ref[...]
        bias = b_ref[...]
        C = w.shape[0]
        Mp = x_ref.shape[-1]
        inv_m = 1.0 / float(m_valid)

        r = lax.broadcasted_iota(jnp.int32, (C, C), 0)
        c = lax.broadcasted_iota(jnp.int32, (C, C), 1)
        eye = (r == c).astype(jnp.float32)

        # Mask for padded spatial columns (conv bias + ReLU makes them nonzero,
        # and centering would make them -mean; both must be zeroed).
        col = lax.broadcasted_iota(jnp.int32, (1, Mp), 1)
        mask = (col < m_valid).astype(jnp.float32)

        for i in range(bblk):  # small static unroll over images in the block
            xi = x_ref[i]                                               # (C_in, Mp)
            feat = jnp.dot(w, xi, preferred_element_type=jnp.float32) + bias
            feat = jnp.maximum(feat, 0.0) * mask                        # (C, Mp)

            # Covariance with centering matrix Ibar = (1/M)(I - (1/M) 11^T):
            # Sigma = X Ibar X^T == (1/M) Xc Xc^T ; contract last (lane) dims
            # of both operands directly — no explicit transpose.
            mean = jnp.sum(feat, axis=1, keepdims=True) * inv_m
            xc = (feat - mean) * mask
            sigma = lax.dot_general(
                xc, xc, (((1,), (1,)), ((), ())),
                preferred_element_type=jnp.float32) * inv_m             # (C, C)

            # trace(Sigma) == (1/M) * sum(Xc * Xc): no sigma*eye materialization.
            # NOTE: matches reference semantics — no epsilon guard (all-zero
            # post-ReLU features would give trace=0 / NaN in PyTorch too).
            trace = jnp.sum(xc * xc, keepdims=True) * inv_m             # (1, 1)
            a = sigma * pl.reciprocal(trace, approx=False)

            # Newton-Schulz matrix square root.
            #   iter 0: z == I  =>  t = 0.5*(3I - y), y <- y t, z <- t
            t = 0.5 * (3.0 * eye - a)
            y = jnp.dot(a, t, preferred_element_type=jnp.float32)
            z = t
            for _ in range(ns_iters - 2):
                t = 0.5 * (3.0 * eye
                           - jnp.dot(z, y, preferred_element_type=jnp.float32))
                y_next = jnp.dot(y, t, preferred_element_type=jnp.float32)
                z = jnp.dot(t, z, preferred_element_type=jnp.float32)
                y = y_next
            #   last iter: z update is dead work — drop it.
            t = 0.5 * (3.0 * eye
                       - jnp.dot(z, y, preferred_element_type=jnp.float32))
            y = jnp.dot(y, t, preferred_element_type=jnp.float32)

            o_ref[i] = y * jnp.sqrt(trace)

    return kernel


# ----------------------- tiled classifier (linear) ------------------------- #

def _linear_kernel(x_ref, w_ref, b_ref, o_ref, acc_ref):
    # grid = (N_tiles, D_tiles); reduction axis (D) last / "arbitrary".
    k = pl.program_id(1)

    @pl.when(k == 0)
    def _():
        acc_ref[...] = jnp.zeros_like(acc_ref)

    acc_ref[...] += jnp.dot(x_ref[...], w_ref[...],
                            preferred_element_type=jnp.float32)

    @pl.when(k == pl.num_programs(1) - 1)
    def _():
        o_ref[...] = acc_ref[...] + b_ref[...]


# ------------------------------- wrapper ----------------------------------- #

def basemodel_forward(x, conv_w, conv_b, fc_w, fc_b, extract_feature_vector=False):
    B, C_in, H, W = x.shape
    M = H * W
    C = conv_w.shape[0]          # representation_dim channels
    num_classes = fc_w.shape[0]

    # Flatten spatial dims to the lane axis and pad to a multiple of 128.
    Mp = _round_up(M, 128)
    x2 = x.reshape(B, C_in, M).astype(jnp.float32)
    if Mp != M:
        x2 = jnp.pad(x2, ((0, 0), (0, 0), (0, Mp - M)))

    # 1+2) fused features + MPNCOV representation (batched grid, parallel axis
    # so v7x's two TensorCores can split images).
    bblk = _pick_batch_block(B)
    cov_sqrt = pl.pallas_call(
        _make_feat_mpncov_kernel(bblk, M, _NS_ITERS),
        out_shape=jax.ShapeDtypeStruct((B, C, C), jnp.float32),
        grid=(B // bblk,),
        in_specs=[
            pl.BlockSpec((bblk, C_in, Mp), lambda b: (b, 0, 0)),
            pl.BlockSpec((C, C_in), lambda b: (0, 0)),
            pl.BlockSpec((C, 1), lambda b: (0, 0)),
        ],
        out_specs=pl.BlockSpec((bblk, C, C), lambda b: (b, 0, 0)),
        compiler_params=pltpu.CompilerParams(
            dimension_semantics=("parallel",)),
    )(x2, conv_w.astype(jnp.float32), conv_b.astype(jnp.float32))

    if extract_feature_vector:
        # Triuvec (row-major upper triangle incl. diagonal) + x.view(B, -1).
        # TODO(synk): in-kernel upper-triangle compaction (masked stores) not
        # implemented; this path uses a JAX-level gather as glue.
        iu_r, iu_c = np.triu_indices(C)
        return cov_sqrt[:, iu_r, iu_c].reshape(B, -1)

    # 3) classifier. Fold Triuvec into the FC weights: scatter fc_w into a
    # (num_classes, C*C) matrix with zeros below the diagonal, pre-transpose,
    # and contract against the flattened full (C, C) representation — no
    # host-side gather, no in-kernel transpose.
    iu_r, iu_c = np.triu_indices(C)
    flat_idx = jnp.asarray(iu_r * C + iu_c)
    w_full = jnp.zeros((num_classes, C * C), jnp.float32)
    w_full = w_full.at[:, flat_idx].set(fc_w.astype(jnp.float32))
    w_t = w_full.T                                      # (C*C, num_classes)

    d_full = C * C
    n_pad = _round_up(num_classes, 128)
    tn = min(n_pad, 256)
    n_pad = _round_up(n_pad, tn)
    d_pad = _round_up(d_full, 128)
    tk = min(d_pad, 2048)
    d_pad = _round_up(d_pad, tk)

    x_flat = cov_sqrt.reshape(B, d_full)
    if d_pad != d_full:
        x_flat = jnp.pad(x_flat, ((0, 0), (0, d_pad - d_full)))
    w_pad = jnp.pad(w_t, ((0, d_pad - d_full), (0, n_pad - num_classes)))
    b_pad = jnp.pad(fc_b.astype(jnp.float32).reshape(1, num_classes),
                    ((0, 0), (0, n_pad - num_classes)))

    out = pl.pallas_call(
        _linear_kernel,
        out_shape=jax.ShapeDtypeStruct((B, n_pad), jnp.float32),
        grid=(n_pad // tn, d_pad // tk),
        in_specs=[
            pl.BlockSpec((B, tk), lambda j, k: (0, k)),
            pl.BlockSpec((tk, tn), lambda j, k: (k, j)),
            pl.BlockSpec((1, tn), lambda j, k: (0, j)),
        ],
        out_specs=pl.BlockSpec((B, tn), lambda j, k: (0, j)),
        scratch_shapes=[pltpu.VMEM((B, tn), jnp.float32)],
        compiler_params=pltpu.CompilerParams(
            dimension_semantics=("parallel", "arbitrary")),
    )(x_flat, w_pad, b_pad)

    return out[:, :num_classes]


# ------------------------ pure-JAX reference -------------------------------- #

def _reference_forward(x, conv_w, conv_b, fc_w, fc_b, extract_feature_vector=False):
    B, C_in, H, W = x.shape
    M = H * W
    C = conv_w.shape[0]
    x2 = x.reshape(B, C_in, M)
    feat = jnp.maximum(jnp.einsum("oc,bcm->bom", conv_w, x2) + conv_b[None], 0.0)
    mean = jnp.mean(feat, axis=2, keepdims=True)
    xc = feat - mean
    sigma = jnp.einsum("bcm,bdm->bcd", xc, xc) / M
    eye = jnp.eye(C, dtype=jnp.float32)
    trace = jnp.trace(sigma, axis1=1, axis2=2)[:, None, None]
    a = sigma / trace
    y, z = a, jnp.broadcast_to(eye, a.shape)
    for _ in range(_NS_ITERS):
        t = 0.5 * (3.0 * eye - jnp.einsum("bij,bjk->bik", z, y))
        y = jnp.einsum("bij,bjk->bik", y, t)
        z = jnp.einsum("bij,bjk->bik", t, z)
    y = y * jnp.sqrt(trace)
    iu_r, iu_c = np.triu_indices(C)
    vec = y[:, iu_r, iu_c].reshape(B, -1)
    if extract_feature_vector:
        return vec
    return vec @ fc_w.T + fc_b[None]


# --------------------------------- main ------------------------------------- #

if __name__ == "__main__":
    key = jax.random.PRNGKey(0)
    B, C_in, H, W = 2, 4, 16, 16
    C_feat = 16          # representation_dim (small stand-in for 256)
    num_classes = 10
    D = C_feat * (C_feat + 1) // 2

    k1, k2, k3, k4, k5 = jax.random.split(key, 5)
    x = jax.random.normal(k1, (B, C_in, H, W), jnp.float32)
    conv_w = jax.random.normal(k2, (C_feat, C_in), jnp.float32) * 0.1
    conv_b = jax.random.normal(k3, (C_feat, 1), jnp.float32) * 0.01
    fc_w = jax.random.normal(k4, (num_classes, D), jnp.float32) * 0.05
    fc_b = jax.random.normal(k5, (num_classes,), jnp.float32) * 0.01

    # classifier path (extract_feature_vector=False)
    logits = basemodel_forward(x, conv_w, conv_b, fc_w, fc_b,
                               extract_feature_vector=False)
    logits = jax.block_until_ready(logits)

    # feature-vector path (extract_feature_vector=True)
    feats = basemodel_forward(x, conv_w, conv_b, fc_w, fc_b,
                              extract_feature_vector=True)
    feats = jax.block_until_ready(feats)

    ref_logits = _reference_forward(x, conv_w, conv_b, fc_w, fc_b, False)
    ref_feats = _reference_forward(x, conv_w, conv_b, fc_w, fc_b, True)

    assert logits.shape == (B, num_classes)
    assert feats.shape == (B, D)
    np.testing.assert_allclose(np.asarray(logits), np.asarray(ref_logits),
                               rtol=1e-3, atol=1e-3)
    np.testing.assert_allclose(np.asarray(feats), np.asarray(ref_feats),
                               rtol=1e-3, atol=1e-3)

    print("KERNEL_OK")
</pallas_src>

<mosaic_0001>
module attributes {stable_mosaic.version = 11 : i64} {
  func.func @kernel(%arg0: i32, %arg1: memref<2x4x256xf32, #tpu.memory_space<vmem>>, %arg2: memref<16x4xf32, #tpu.memory_space<vmem>>, %arg3: memref<16x1xf32, #tpu.memory_space<vmem>>, %arg4: memref<2x16x16xf32, #tpu.memory_space<vmem>>) attributes {dimension_semantics = [#tpu.dimension_semantics<parallel>], iteration_bounds = array<i64: 1>, scalar_prefetch = 0 : i64, scratch_operands = 0 : i64, tpu.core_type = #tpu.core_type<tc>, window_params = [{transform_indices = @transform_0, window_bounds = array<i64: 2, 4, 256>}, {pipeline_mode = #tpu.pipeline_mode<synchronous>, transform_indices = @transform_1, window_bounds = array<i64: 16, 4>}, {pipeline_mode = #tpu.pipeline_mode<synchronous>, transform_indices = @transform_2, window_bounds = array<i64: 16, 1>}, {transform_indices = @transform_3, window_bounds = array<i64: 2, 16, 16>}]} {
    %c0 = arith.constant 0 : index
    %c0_0 = arith.constant 0 : index
    %0 = vector.load %arg2[%c0, %c0_0] : memref<16x4xf32, #tpu.memory_space<vmem>>, vector<16x4xf32>
    %c0_1 = arith.constant 0 : index
    %c0_2 = arith.constant 0 : index
    %1 = vector.load %arg3[%c0_1, %c0_2] : memref<16x1xf32, #tpu.memory_space<vmem>>, vector<16x1xf32>
    %2 = tpu.iota {dimensions = array<i32: 0>} : vector<16x16xi32>
    %3 = tpu.iota {dimensions = array<i32: 1>} : vector<16x16xi32>
    %4 = arith.cmpi eq, %2, %3 : vector<16x16xi32>
    %5 = arith.extui %4 : vector<16x16xi1> to vector<16x16xi32>
    %6 = arith.sitofp %5 : vector<16x16xi32> to vector<16x16xf32>
    %7 = tpu.iota {dimensions = array<i32: 1>} : vector<1x256xi32>
    %c256_i32 = arith.constant 256 : i32
    %8 = vector.broadcast %c256_i32 : i32 to vector<1x256xi32>
    %9 = arith.cmpi slt, %7, %8 : vector<1x256xi32>
    %10 = arith.extui %9 : vector<1x256xi1> to vector<1x256xi32>
    %11 = arith.sitofp %10 : vector<1x256xi32> to vector<1x256xf32>
    %c0_3 = arith.constant 0 : index
    %c0_4 = arith.constant 0 : index
    %c0_5 = arith.constant 0 : index
    %12 = vector.load %arg1[%c0_3, %c0_4, %c0_5] : memref<2x4x256xf32, #tpu.memory_space<vmem>>, vector<1x4x256xf32>
    %13 = vector.shape_cast %12 : vector<1x4x256xf32> to vector<4x256xf32>
    %cst = arith.constant dense<0.000000e+00> : vector<16x256xf32>
    %14 = tpu.matmul %0, %13, %cst {dimension_numbers = #tpu.dot_dimension_numbers<[1], [0], [0], [1], [0, 0, 1, 1], [], []>} : vector<16x4xf32>, vector<4x256xf32>, vector<16x256xf32> -> vector<16x256xf32>
    %15 = vector.broadcast %1 : vector<16x1xf32> to vector<16x256xf32>
    %16 = arith.addf %14, %15 : vector<16x256xf32>
    %cst_6 = arith.constant 0.000000e+00 : f32
    %17 = vector.broadcast %cst_6 : f32 to vector<16x256xf32>
    %18 = arith.maximumf %16, %17 : vector<16x256xf32>
    %19 = vector.broadcast %11 : vector<1x256xf32> to vector<16x256xf32>
    %20 = arith.mulf %18, %19 : vector<16x256xf32>
    %cst_7 = arith.constant dense<0.000000e+00> : vector<16xf32>
    %21 = vector.multi_reduction <add>, %20, %cst_7 [1] : vector<16x256xf32> to vector<16xf32>
    %22 = vector.shape_cast %21 : vector<16xf32> to vector<16x1xf32>
    %cst_8 = arith.constant 3.906250e-03 : f32
    %23 = vector.broadcast %cst_8 : f32 to vector<16x1xf32>
    %24 = arith.mulf %22, %23 : vector<16x1xf32>
    %25 = vector.broadcast %24 : vector<16x1xf32> to vector<16x256xf32>
    %26 = arith.subf %20, %25 : vector<16x256xf32>
    %27 = vector.broadcast %11 : vector<1x256xf32> to vector<16x256xf32>
    %28 = arith.mulf %26, %27 : vector<16x256xf32>
    %cst_9 = arith.constant dense<0.000000e+00> : vector<16x16xf32>
    %29 = tpu.matmul %28, %28, %cst_9 {dimension_numbers = #tpu.dot_dimension_numbers<[1], [1], [0], [0], [0, 0, 1, 0], [], []>} : vector<16x256xf32>, vector<16x256xf32>, vector<16x16xf32> -> vector<16x16xf32>
    %cst_10 = arith.constant 3.906250e-03 : f32
    %30 = vector.broadcast %cst_10 : f32 to vector<16x16xf32>
    %31 = arith.mulf %29, %30 : vector<16x16xf32>
    %32 = arith.mulf %28, %28 : vector<16x256xf32>
    %33 = vector.shape_cast %32 : vector<16x256xf32> to vector<1x16x256xf32>
    %cst_11 = arith.constant dense<0.000000e+00> : vector<1xf32>
    %34 = vector.multi_reduction <add>, %33, %cst_11 [1, 2] : vector<1x16x256xf32> to vector<1xf32>
    %35 = vector.shape_cast %34 : vector<1xf32> to vector<1x1x1xf32>
    %36 = vector.extract %35[0, 0, 0] : f32 from vector<1x1x1xf32>
    %37 = vector.broadcast %36 : f32 to vector<1x1xf32>
    %cst_12 = arith.constant 3.906250e-03 : f32
    %38 = vector.broadcast %cst_12 : f32 to vector<1x1xf32>
    %39 = arith.mulf %37, %38 : vector<1x1xf32>
    %40 = tpu.reciprocal %39 : vector<1x1xf32> -> vector<1x1xf32>
    %41 = vector.broadcast %40 : vector<1x1xf32> to vector<16x16xf32>
    %42 = arith.mulf %31, %41 : vector<16x16xf32>
    %cst_13 = arith.constant 3.000000e+00 : f32
    %43 = vector.broadcast %cst_13 : f32 to vector<16x16xf32>
    %44 = arith.mulf %43, %6 : vector<16x16xf32>
    %45 = arith.subf %44, %42 : vector<16x16xf32>
    %cst_14 = arith.constant 5.000000e-01 : f32
    %46 = vector.broadcast %cst_14 : f32 to vector<16x16xf32>
    %47 = arith.mulf %46, %45 : vector<16x16xf32>
    %cst_15 = arith.constant dense<0.000000e+00> : vector<16x16xf32>
    %48 = tpu.matmul %42, %47, %cst_15 {dimension_numbers = #tpu.dot_dimension_numbers<[1], [0], [0], [1], [0, 0, 1, 1], [], []>} : vector<16x16xf32>, vector<16x16xf32>, vector<16x16xf32> -> vector<16x16xf32>
    %cst_16 = arith.constant 3.000000e+00 : f32
    %49 = vector.broadcast %cst_16 : f32 to vector<16x16xf32>
    %50 = arith.mulf %49, %6 : vector<16x16xf32>
    %cst_17 = arith.constant dense<0.000000e+00> : vector<16x16xf32>
    %51 = tpu.matmul %47, %48, %cst_17 {dimension_numbers = #tpu.dot_dimension_numbers<[1], [0], [0], [1], [0, 0, 1, 1], [], []>} : vector<16x16xf32>, vector<16x16xf32>, vector<16x16xf32> -> vector<16x16xf32>
    %52 = arith.subf %50, %51 : vector<16x16xf32>
    %cst_18 = arith.constant 5.000000e-01 : f32
    %53 = vector.broadcast %cst_18 : f32 to vector<16x16xf32>
    %54 = arith.mulf %53, %52 : vector<16x16xf32>
    %cst_19 = arith.constant dense<0.000000e+00> : vector<16x16xf32>
    %55 = tpu.matmul %48, %54, %cst_19 {dimension_numbers = #tpu.dot_dimension_numbers<[1], [0], [0], [1], [0, 0, 1, 1], [], []>} : vector<16x16xf32>, vector<16x16xf32>, vector<16x16xf32> -> vector<16x16xf32>
    %cst_20 = arith.constant dense<0.000000e+00> : vector<16x16xf32>
    %56 = tpu.matmul %54, %47, %cst_20 {dimension_numbers = #tpu.dot_dimension_numbers<[1], [0], [0], [1], [0, 0, 1, 1], [], []>} : vector<16x16xf32>, vector<16x16xf32>, vector<16x16xf32> -> vector<16x16xf32>
    %cst_21 = arith.constant 3.000000e+00 : f32
    %57 = vector.broadcast %cst_21 : f32 to vector<16x16xf32>
    %58 = arith.mulf %57, %6 : vector<16x16xf32>
    %cst_22 = arith.constant dense<0.000000e+00> : vector<16x16xf32>
    %59 = tpu.matmul %56, %55, %cst_22 {dimension_numbers = #tpu.dot_dimension_numbers<[1], [0], [0], [1], [0, 0, 1, 1], [], []>} : vector<16x16xf32>, vector<16x16xf32>, vector<16x16xf32> -> vector<16x16xf32>
    %60 = arith.subf %58, %59 : vector<16x16xf32>
    %cst_23 = arith.constant 5.000000e-01 : f32
    %61 = vector.broadcast %cst_23 : f32 to vector<16x16xf32>
    %62 = arith.mulf %61, %60 : vector<16x16xf32>
    %cst_24 = arith.constant dense<0.000000e+00> : vector<16x16xf32>
    %63 = tpu.matmul %55, %62, %cst_24 {dimension_numbers = #tpu.dot_dimension_numbers<[1], [0], [0], [1], [0, 0, 1, 1], [], []>} : vector<16x16xf32>, vector<16x16xf32>, vector<16x16xf32> -> vector<16x16xf32>
    %cst_25 = arith.constant dense<0.000000e+00> : vector<16x16xf32>
    %64 = tpu.matmul %62, %56, %cst_25 {dimension_numbers = #tpu.dot_dimension_numbers<[1], [0], [0], [1], [0, 0, 1, 1], [], []>} : vector<16x16xf32>, vector<16x16xf32>, vector<16x16xf32> -> vector<16x16xf32>
    %cst_26 = arith.constant 3.000000e+00 : f32
    %65 = vector.broadcast %cst_26 : f32 to vector<16x16xf32>
    %66 = arith.mulf %65, %6 : vector<16x16xf32>
    %cst_27 = arith.constant dense<0.000000e+00> : vector<16x16xf32>
    %67 = tpu.matmul %64, %63, %cst_27 {dimension_numbers = #tpu.dot_dimension_numbers<[1], [0], [0], [1], [0, 0, 1, 1], [], []>} : vector<16x16xf32>, vector<16x16xf32>, vector<16x16xf32> -> vector<16x16xf32>
    %68 = arith.subf %66, %67 : vector<16x16xf32>
    %cst_28 = arith.constant 5.000000e-01 : f32
    %69 = vector.broadcast %cst_28 : f32 to vector<16x16xf32>
    %70 = arith.mulf %69, %68 : vector<16x16xf32>
    %cst_29 = arith.constant dense<0.000000e+00> : vector<16x16xf32>
    %71 = tpu.matmul %63, %70, %cst_29 {dimension_numbers = #tpu.dot_dimension_numbers<[1], [0], [0], [1], [0, 0, 1, 1], [], []>} : vector<16x16xf32>, vector<16x16xf32>, vector<16x16xf32> -> vector<16x16xf32>
    %cst_30 = arith.constant dense<0.000000e+00> : vector<16x16xf32>
    %72 = tpu.matmul %70, %64, %cst_30 {dimension_numbers = #tpu.dot_dimension_numbers<[1], [0], [0], [1], [0, 0, 1, 1], [], []>} : vector<16x16xf32>, vector<16x16xf32>, vector<16x16xf32> -> vector<16x16xf32>
    %cst_31 = arith.constant 3.000000e+00 : f32
    %73 = vector.broadcast %cst_31 : f32 to vector<16x16xf32>
    %74 = arith.mulf %73, %6 : vector<16x16xf32>
    %cst_32 = arith.constant dense<0.000000e+00> : vector<16x16xf32>
    %75 = tpu.matmul %72, %71, %cst_32 {dimension_numbers = #tpu.dot_dimension_numbers<[1], [0], [0], [1], [0, 0, 1, 1], [], []>} : vector<16x16xf32>, vector<16x16xf32>, vector<16x16xf32> -> vector<16x16xf32>
    %76 = arith.subf %74, %75 : vector<16x16xf32>
    %cst_33 = arith.constant 5.000000e-01 : f32
    %77 = vector.broadcast %cst_33 : f32 to vector<16x16xf32>
    %78 = arith.mulf %77, %76 : vector<16x16xf32>
    %cst_34 = arith.constant dense<0.000000e+00> : vector<16x16xf32>
    %79 = tpu.matmul %71, %78, %cst_34 {dimension_numbers = #tpu.dot_dimension_numbers<[1], [0], [0], [1], [0, 0, 1, 1], [], []>} : vector<16x16xf32>, vector<16x16xf32>, vector<16x16xf32> -> vector<16x16xf32>
    %80 = math.sqrt %39 : vector<1x1xf32>
    %81 = vector.broadcast %80 : vector<1x1xf32> to vector<16x16xf32>
    %82 = arith.mulf %79, %81 : vector<16x16xf32>
    %c0_35 = arith.constant 0 : index
    %c0_36 = arith.constant 0 : index
    %c0_37 = arith.constant 0 : index
    %83 = vector.load %arg4[%c0_35, %c0_36, %c0_37] : memref<2x16x16xf32, #tpu.memory_space<vmem>>, vector<1x16x16xf32>
    %84 = vector.shape_cast %83 : vector<1x16x16xf32> to vector<16x16xf32>
    %85 = vector.shape_cast %82 : vector<16x16xf32> to vector<1x16x16xf32>
    tpu.vector_store %arg4[%c0_35, %c0_36, %c0_37], %85 {strides = array<i32>} : memref<2x16x16xf32, #tpu.memory_space<vmem>>, vector<1x16x16xf32>,
    %c1 = arith.constant 1 : index
    %c0_38 = arith.constant 0 : index
    %c0_39 = arith.constant 0 : index
    %86 = vector.load %arg1[%c1, %c0_38, %c0_39] : memref<2x4x256xf32, #tpu.memory_space<vmem>>, vector<1x4x256xf32>
    %87 = vector.shape_cast %86 : vector<1x4x256xf32> to vector<4x256xf32>
    %cst_40 = arith.constant dense<0.000000e+00> : vector<16x256xf32>
    %88 = tpu.matmul %0, %87, %cst_40 {dimension_numbers = #tpu.dot_dimension_numbers<[1], [0], [0], [1], [0, 0, 1, 1], [], []>} : vector<16x4xf32>, vector<4x256xf32>, vector<16x256xf32> -> vector<16x256xf32>
    %89 = vector.broadcast %1 : vector<16x1xf32> to vector<16x256xf32>
    %90 = arith.addf %88, %89 : vector<16x256xf32>
    %cst_41 = arith.constant 0.000000e+00 : f32
    %91 = vector.broadcast %cst_41 : f32 to vector<16x256xf32>
    %92 = arith.maximumf %90, %91 : vector<16x256xf32>
    %93 = vector.broadcast %11 : vector<1x256xf32> to vector<16x256xf32>
    %94 = arith.mulf %92, %93 : vector<16x256xf32>
    %cst_42 = arith.constant dense<0.000000e+00> : vector<16xf32>
    %95 = vector.multi_reduction <add>, %94, %cst_42 [1] : vector<16x256xf32> to vector<16xf32>
    %96 = vector.shape_cast %95 : vector<16xf32> to vector<16x1xf32>
    %cst_43 = arith.constant 3.906250e-03 : f32
    %97 = vector.broadcast %cst_43 : f32 to vector<16x1xf32>
    %98 = arith.mulf %96, %97 : vector<16x1xf32>
    %99 = vector.broadcast %98 : vector<16x1xf32> to vector<16x256xf32>
    %100 = arith.subf %94, %99 : vector<16x256xf32>
    %101 = vector.broadcast %11 : vector<1x256xf32> to vector<16x256xf32>
    %102 = arith.mulf %100, %101 : vector<16x256xf32>
    %cst_44 = arith.constant dense<0.000000e+00> : vector<16x16xf32>
    %103 = tpu.matmul %102, %102, %cst_44 {dimension_numbers = #tpu.dot_dimension_numbers<[1], [1], [0], [0], [0, 0, 1, 0], [], []>} : vector<16x256xf32>, vector<16x256xf32>, vector<16x16xf32> -> vector<16x16xf32>
    %cst_45 = arith.constant 3.906250e-03 : f32
    %104 = vector.broadcast %cst_45 : f32 to vector<16x16xf32>
    %105 = arith.mulf %103, %104 : vector<16x16xf32>
    %106 = arith.mulf %102, %102 : vector<16x256xf32>
    %107 = vector.shape_cast %106 : vector<16x256xf32> to vector<1x16x256xf32>
    %cst_46 = arith.constant dense<0.000000e+00> : vector<1xf32>
    %108 = vector.multi_reduction <add>, %107, %cst_46 [1, 2] : vector<1x16x256xf32> to vector<1xf32>
    %109 = vector.shape_cast %108 : vector<1xf32> to vector<1x1x1xf32>
    %110 = vector.extract %109[0, 0, 0] : f32 from vector<1x1x1xf32>
    %111 = vector.broadcast %110 : f32 to vector<1x1xf32>
    %cst_47 = arith.constant 3.906250e-03 : f32
    %112 = vector.broadcast %cst_47 : f32 to vector<1x1xf32>
    %113 = arith.mulf %111, %112 : vector<1x1xf32>
    %114 = tpu.reciprocal %113 : vector<1x1xf32> -> vector<1x1xf32>
    %115 = vector.broadcast %114 : vector<1x1xf32> to vector<16x16xf32>
    %116 = arith.mulf %105, %115 : vector<16x16xf32>
    %cst_48 = arith.constant 3.000000e+00 : f32
    %117 = vector.broadcast %cst_48 : f32 to vector<16x16xf32>
    %118 = arith.mulf %117, %6 : vector<16x16xf32>
    %119 = arith.subf %118, %116 : vector<16x16xf32>
    %cst_49 = arith.constant 5.000000e-01 : f32
    %120 = vector.broadcast %cst_49 : f32 to vector<16x16xf32>
    %121 = arith.mulf %120, %119 : vector<16x16xf32>
    %cst_50 = arith.constant dense<0.000000e+00> : vector<16x16xf32>
    %122 = tpu.matmul %116, %121, %cst_50 {dimension_numbers = #tpu.dot_dimension_numbers<[1], [0], [0], [1], [0, 0, 1, 1], [], []>} : vector<16x16xf32>, vector<16x16xf32>, vector<16x16xf32> -> vector<16x16xf32>
    %cst_51 = arith.constant 3.000000e+00 : f32
    %123 = vector.broadcast %cst_51 : f32 to vector<16x16xf32>
    %124 = arith.mulf %123, %6 : vector<16x16xf32>
    %cst_52 = arith.constant dense<0.000000e+00> : vector<16x16xf32>
    %125 = tpu.matmul %121, %122, %cst_52 {dimension_numbers = #tpu.dot_dimension_numbers<[1], [0], [0], [1], [0, 0, 1, 1], [], []>} : vector<16x16xf32>, vector<16x16xf32>, vector<16x16xf32> -> vector<16x16xf32>
    %126 = arith.subf %124, %125 : vector<16x16xf32>
    %cst_53 = arith.constant 5.000000e-01 : f32
    %127 = vector.broadcast %cst_53 : f32 to vector<16x16xf32>
    %128 = arith.mulf %127, %126 : vector<16x16xf32>
    %cst_54 = arith.constant dense<0.000000e+00> : vector<16x16xf32>
    %129 = tpu.matmul %122, %128, %cst_54 {dimension_numbers = #tpu.dot_dimension_numbers<[1], [0], [0], [1], [0, 0, 1, 1], [], []>} : vector<16x16xf32>, vector<16x16xf32>, vector<16x16xf32> -> vector<16x16xf32>
    %cst_55 = arith.constant dense<0.000000e+00> : vector<16x16xf32>
    %130 = tpu.matmul %128, %121, %cst_55 {dimension_numbers = #tpu.dot_dimension_numbers<[1], [0], [0], [1], [0, 0, 1, 1], [], []>} : vector<16x16xf32>, vector<16x16xf32>, vector<16x16xf32> -> vector<16x16xf32>
    %cst_56 = arith.constant 3.000000e+00 : f32
    %131 = vector.broadcast %cst_56 : f32 to vector<16x16xf32>
    %132 = arith.mulf %131, %6 : vector<16x16xf32>
    %cst_57 = arith.constant dense<0.000000e+00> : vector<16x16xf32>
    %133 = tpu.matmul %130, %129, %cst_57 {dimension_numbers = #tpu.dot_dimension_numbers<[1], [0], [0], [1], [0, 0, 1, 1], [], []>} : vector<16x16xf32>, vector<16x16xf32>, vector<16x16xf32> -> vector<16x16xf32>
    %134 = arith.subf %132, %133 : vector<16x16xf32>
    %cst_58 = arith.constant 5.000000e-01 : f32
    %135 = vector.broadcast %cst_58 : f32 to vector<16x16xf32>
    %136 = arith.mulf %135, %134 : vector<16x16xf32>
    %cst_59 = arith.constant dense<0.000000e+00> : vector<16x16xf32>
    %137 = tpu.matmul %129, %136, %cst_59 {dimension_numbers = #tpu.dot_dimension_numbers<[1], [0], [0], [1], [0, 0, 1, 1], [], []>} : vector<16x16xf32>, vector<16x16xf32>, vector<16x16xf32> -> vector<16x16xf32>
    %cst_60 = arith.constant dense<0.000000e+00> : vector<16x16xf32>
    %138 = tpu.matmul %136, %130, %cst_60 {dimension_numbers = #tpu.dot_dimension_numbers<[1], [0], [0], [1], [0, 0, 1, 1], [], []>} : vector<16x16xf32>, vector<16x16xf32>, vector<16x16xf32> -> vector<16x16xf32>
    %cst_61 = arith.constant 3.000000e+00 : f32
    %139 = vector.broadcast %cst_61 : f32 to vector<16x16xf32>
    %140 = arith.mulf %139, %6 : vector<16x16xf32>
    %cst_62 = arith.constant dense<0.000000e+00> : vector<16x16xf32>
    %141 = tpu.matmul %138, %137, %cst_62 {dimension_numbers = #tpu.dot_dimension_numbers<[1], [0], [0], [1], [0, 0, 1, 1], [], []>} : vector<16x16xf32>, vector<16x16xf32>, vector<16x16xf32> -> vector<16x16xf32>
    %142 = arith.subf %140, %141 : vector<16x16xf32>
    %cst_63 = arith.constant 5.000000e-01 : f32
    %143 = vector.broadcast %cst_63 : f32 to vector<16x16xf32>
    %144 = arith.mulf %143, %142 : vector<16x16xf32>
    %cst_64 = arith.constant dense<0.000000e+00> : vector<16x16xf32>
    %145 = tpu.matmul %137, %144, %cst_64 {dimension_numbers = #tpu.dot_dimension_numbers<[1], [0], [0], [1], [0, 0, 1, 1], [], []>} : vector<16x16xf32>, vector<16x16xf32>, vector<16x16xf32> -> vector<16x16xf32>
    %cst_65 = arith.constant dense<0.000000e+00> : vector<16x16xf32>
    %146 = tpu.matmul %144, %138, %cst_65 {dimension_numbers = #tpu.dot_dimension_numbers<[1], [0], [0], [1], [0, 0, 1, 1], [], []>} : vector<16x16xf32>, vector<16x16xf32>, vector<16x16xf32> -> vector<16x16xf32>
    %cst_66 = arith.constant 3.000000e+00 : f32
    %147 = vector.broadcast %cst_66 : f32 to vector<16x16xf32>
    %148 = arith.mulf %147, %6 : vector<16x16xf32>
    %cst_67 = arith.constant dense<0.000000e+00> : vector<16x16xf32>
    %149 = tpu.matmul %146, %145, %cst_67 {dimension_numbers = #tpu.dot_dimension_numbers<[1], [0], [0], [1], [0, 0, 1, 1], [], []>} : vector<16x16xf32>, vector<16x16xf32>, vector<16x16xf32> -> vector<16x16xf32>
    %150 = arith.subf %148, %149 : vector<16x16xf32>
    %cst_68 = arith.constant 5.000000e-01 : f32
    %151 = vector.broadcast %cst_68 : f32 to vector<16x16xf32>
    %152 = arith.mulf %151, %150 : vector<16x16xf32>
    %cst_69 = arith.constant dense<0.000000e+00> : vector<16x16xf32>
    %153 = tpu.matmul %145, %152, %cst_69 {dimension_numbers = #tpu.dot_dimension_numbers<[1], [0], [0], [1], [0, 0, 1, 1], [], []>} : vector<16x16xf32>, vector<16x16xf32>, vector<16x16xf32> -> vector<16x16xf32>
    %154 = math.sqrt %113 : vector<1x1xf32>
    %155 = vector.broadcast %154 : vector<1x1xf32> to vector<16x16xf32>
    %156 = arith.mulf %153, %155 : vector<16x16xf32>
    %c1_70 = arith.constant 1 : index
    %c0_71 = arith.constant 0 : index
    %c0_72 = arith.constant 0 : index
    %157 = vector.load %arg4[%c1_70, %c0_71, %c0_72] : memref<2x16x16xf32, #tpu.memory_space<vmem>>, vector<1x16x16xf32>
    %158 = vector.shape_cast %157 : vector<1x16x16xf32> to vector<16x16xf32>
    %159 = vector.shape_cast %156 : vector<16x16xf32> to vector<1x16x16xf32>
    tpu.vector_store %arg4[%c1_70, %c0_71, %c0_72], %159 {strides = array<i32>} : memref<2x16x16xf32, #tpu.memory_space<vmem>>, vector<1x16x16xf32>,
    return
  }
  func.func @transform_0(%arg0: i32) -> (i32, i32, i32) {
    %c0_i32 = arith.constant 0 : i32
    %c0_i32_0 = arith.constant 0 : i32
    %c0_i32_1 = arith.constant 0 : i32
    return %arg0, %c0_i32, %c0_i32_0 : i32, i32, i32
  }
  func.func @transform_1(%arg0: i32) -> (i32, i32) {
    %c0_i32 = arith.constant 0 : i32
    %c0_i32_0 = arith.constant 0 : i32
    %c0_i32_1 = arith.constant 0 : i32
    return %c0_i32, %c0_i32_0 : i32, i32
  }
  func.func @transform_2(%arg0: i32) -> (i32, i32) {
    %c0_i32 = arith.constant 0 : i32
    %c0_i32_0 = arith.constant 0 : i32
    %c0_i32_1 = arith.constant 0 : i32
    return %c0_i32, %c0_i32_0 : i32, i32
  }
  func.func @transform_3(%arg0: i32) -> (i32, i32, i32) {
    %c0_i32 = arith.constant 0 : i32
    %c0_i32_0 = arith.constant 0 : i32
    %c0_i32_1 = arith.constant 0 : i32
    return %arg0, %c0_i32, %c0_i32_0 : i32, i32, i32
  }
}

</mosaic_0001>

<bundles_post_ra>
// kernel: tpu_custom_call.1
= control target key start
LH: loop header
LB: loop body
LE: loop exit
PB: predicated region body
PF: predicated region fallthrough
CT: control target
= control target key end

     0   :  { %vm57_vm0 = vcmask 1043456   ;;  %v2859_v2 = vmov 0.0   ;;  %s3033_s0 = inlined_call_operand.vmem [shape: f32[2,4,256], index: 0, kind: input, shape index: {}]   ;;  %s3034_s1 = inlined_call_operand.vmem [shape: f32[16,4], index: 1, kind: input, shape index: {}]   ;;  %s3035_s2 = inlined_call_operand.vmem [shape: f32[16,1], index: 2, kind: input, shape index: {}]   ;;  %s3036_s3 = inlined_call_operand.hbm [shape: f32[2,16,16], index: 3, kind: output, shape index: {}]  }
   0x1   :  { %v37_v0 = vld [vmem:[%s3033_s0] sm:$0xff]  ;;  %126 = vmatprep.mubr.f32.mxu0 %v2859_v2  ;;  %v18_v3 = vld [vmem:[%s3035_s2 + $0x8] sm:$0xff] }
   0x2   :  { %v49_v1 = vcombine.high %v37_v0, %v37_v0 }
   0x3   :  { %8 = vsyncpa [#allocation3], 0  ;;  %v2894_v4 = vld [vmem:[%s3034_s1] sm:$0xff]  ;;  %vm50_vm1 = vcmask 31744   ;;  %v2860_v5 = vmov 0   ;;  %v2907_v7 = vld [vmem:[%s3034_s1 + $0x8] sm:$0xff]  ;;  %v19_v50 = vlaneseq }
   0x4   :  { %2826 = vset.pattern.permute.xlu0 %v2860_v5  ;;  %2496 = vmatprep.subr.msk.mxu0 %vm57_vm0, %v49_v1  ;;  %v17_v6 = vld [vmem:[%s3035_s2] sm:$0xff]  ;;  %vm267_vm4 = vcmask 130048   ;;  %s2861_s23 = smov [#allocation2]  }
   0x5   :  { %45 = vperm.xlu0 %2826, %v18_v3   ;;  %2497 = vmatpush1.msk.msra.mxu0 %vm57_vm0, %v37_v0  ;;  %v20_v52 = vshrl.u32 %v19_v50, 7  ;;  %v23_v55 = vand.u32 127, %v19_v50  ;;  %s2483_s24 = sshll.u32 %s2861_s23, 4  ;;  %s2484_s24 = int_to_ptr.vmem [resolvable:$true] %s2483_s24 }
   0x6   :  { %2498 = vmatmul.mubr.msk.f32.vlgmr.msra.gmra.mxu0 %vm50_vm1, %v2894_v4  ;;  %s2837_s25 = scalar_lea.vmem %s2484_s24, 512  ;;  %p2842_p1 = scmp.lt.s32.totalorder %s2484_s24, %s2484_s24 }
   0x7   :  { %132 = vmatprep.mubr.f32.mxu0 %v2859_v2  ;;  %v21_v54 = vadd.s32 8, %v20_v52  ;;  %vm24_vm2 = vcmp.eq.s32.totalorder %v20_v52, %v23_v55  ;;  %p2838_p0 = scmp.ne.s32.totalorder %s2484_s24, %s2837_s25  ;;  %p2843_p2 = scmp.lt.s32.totalorder %s2837_s25, %s2837_s25 }
   0x8   :  { %v2494_v56 = vsel %vm24_vm2, 1.0, %v2859_v2 }
   0x9   :  { %40 = vperm.xlu0 %2826, %v17_v6   ;;  %vm25_vm3 = vcmp.eq.s32.totalorder %v21_v54, %v23_v55  ;;  %v2924_v58 = vmul.f32 3.0, %v2494_v56  ;;  %p2844_p3 = por %p2843_p2, %p2842_p1 }
   0xa   :  { %2499 = vmatmul.mubr.msk.f32.gmra.mxu0 %vm50_vm1, %v2907_v7  ;;  %v2495_v57 = vsel %vm25_vm3, 1.0, %v2859_v2 }
   0xb   :  { %v2926_v59 = vmul.f32 3.0, %v2495_v57  ;;  %p2845_p4 = pnand %p2844_p3, %p2838_p0 }
  0x80   :  { %v2911_v8 = vpop.permute.xlu0 %45 }
  0x84   :  { %v2914_v13 = vpop.permute.xlu0 %40 }
  0xc6   :  { %v128_v9 = vpop.f32.mrf.mxu0 }
  0xc7   :  { %v129_v17 = vadd.f32 %v128_v9, %v2914_v13 }
  0xc8   :  { %v130_v10 = vpop.f32.mrf.mxu0 }
  0xc9   :  { %v131_v15 = vadd.f32 %v130_v10, %v2914_v13  ;;  %v139_v22 = vmax.f32 %v129_v17, 0.0 }
  0xca   :  { %v134_v11 = vpop.f32.mrf.mxu0 }
  0xcb   :  { %v135_v12 = vadd.f32 %v134_v11, %v2911_v8  ;;  %v140_v20 = vmax.f32 %v131_v15, 0.0 }
  0xcc   :  { %v136_v14 = vpop.f32.mrf.mxu0 }
  0xcd   :  { %v137_v16 = vadd.f32 %v136_v14, %v2911_v8  ;;  %v141_v18 = vmax.f32 %v135_v12, 0.0  ;;  %v147_v23 = vadd.f32 %v140_v20, %v139_v22 }
  0xcf   :  { %v142_v19 = vmax.f32 %v137_v16, 0.0 }
  0xd1   :  { %v150_v21 = vadd.f32 %v142_v19, %v141_v18 }
  0xd3   :  { %151 = vadd.xlane.f32.xlu1 %v150_v21 }
  0xd7   :  { %148 = vadd.xlane.f32.xlu1 %v147_v23 }
 0x15c   :  { %v152_v24 = vpop.xlane.xlu1 %151 }
 0x15d   :  { %v154_v25 = vmul.f32 0.00390625, %v152_v24 }
 0x15f   :  { %v157_v26 = vsub.f32 %v141_v18, %v154_v25  ;;  %v158_v27 = vsub.f32 %v142_v19, %v154_v25 }
 0x160   :  { %v149_v28 = vpop.xlane.xlu1 %148 }
 0x161   :  { %v153_v29 = vmul.f32 0.00390625, %v149_v28  ;;  %191 = vmatprep.subr.mxu1 %v158_v27  ;;  %v242_v34 = vmul.f32 %v157_v26, %v157_v26  ;;  %v243_v36 = vmul.f32 %v158_v27, %v158_v27 }
 0x162   :  { %192 = vmatpush1.xpose.msra.mxu1 %v157_v26 }
 0x163   :  { %v155_v30 = vsub.f32 %v139_v22, %v153_v29  ;;  %v156_v31 = vsub.f32 %v140_v20, %v153_v29 }
 0x165   :  { %v240_v32 = vmul.f32 %v155_v30, %v155_v30  ;;  %v241_v33 = vmul.f32 %v156_v31, %v156_v31  ;;  %193 = vmatprep.subr.mxu1 %v156_v31  ;;  %227 = vmatprep.mubr.f32.mxu1 %v156_v31 }
 0x166   :  { %194 = vmatpush1.xpose.msra.mxu1 %v155_v30 }
 0x167   :  { %v244_v35 = vadd.f32 %v241_v33, %v240_v32 }
 0x169   :  { %228 = vmatmul.mubr.f32.vlgmr.msra.gmra.mxu1 %v155_v30  ;;  %v245_v37 = vadd.f32 %v244_v35, %v242_v34 }
 0x16a   :  { %232 = vmatprep.mubr.f32.mxu1 %v158_v27 }
 0x16b   :  { %v246_v38 = vadd.f32 %v245_v37, %v243_v36 }
 0x16d   :  { %247 = vadd.xlane.f32.xlu0 %v246_v38  ;;  %233 = vmatmul.mubr.f32.gmra.mxu1 %v157_v26  ;;  %v2524_v38 = vld [vmem:[%s3033_s0 + $0x8] sm:$0xff] }
 0x1f6   :  { %v248_v39 = vpop.xlane.xlu0 %247 }
 0x1f7   :  { %v249_v40 = vrot.slane %v248_v39, 4 }
 0x1f9   :  { %v250_v41 = vadd.f32 %v249_v40, %v248_v39 }
 0x1fb   :  { %v251_v42 = vrot.slane %v250_v41, 2 }
 0x1fd   :  { %v252_v43 = vadd.f32 %v251_v42, %v250_v41  ;;  %v1270_v42 = vcombine.high %v2524_v38, %v2524_v38 }
 0x1ff   :  { %v253_v44 = vrot.slane %v252_v43, 1 }
 0x201   :  { %v254_v45 = vadd.f32 %v253_v44, %v252_v43 }
 0x203   :  { %2817 = vpush %v254_v45 }
 0x229   :  { %v229_v46 = vpop.f32.mrf.mxu1 }
 0x22a   :  { %v238_v60 = vmul.f32 0.00390625, %v229_v46 }
 0x22b   :  { %v231_v47 = vpop.f32.mrf.mxu1 }
 0x22d   :  { %v234_v48 = vpop.f32.mrf.mxu1 }
 0x22e   :  { %v239_v61 = vmul.f32 0.00390625, %v234_v48 }
 0x22f   :  { %v236_v49 = vpop.f32.mrf.mxu1 }
 0x234   :  { %s2818_s1 = spop %2817 }
 0x235   :  { %v256_v51 = vstv %s2818_s1 }
 0x236   :  { %v2919_v53 = vmul.f32 0.00390625, %v256_v51 }
 0x238   :  { %2829 = vrcp.f32 %v2919_v53  ;;  %vm1258_vm5 = vcmp.eq.f32.partialorder %v2919_v53, inf  ;;  %vm1260_vm6 = vcmp.eq.f32.partialorder %v2919_v53, 0.0 }
 0x239   :  { %2831 = vrsqrt.f32 %v2919_v53 }
 0x245   :  { %v2830_v62 = vpop.eup %2829 }
 0x246   :  { %v259_v63 = vmul.f32 %v2830_v62, %v238_v60  ;;  %v260_v0 = vmul.f32 %v2830_v62, %v239_v61 }
 0x248   :  { %v263_v1 = vsub.f32 %v2924_v58, %v259_v63  ;;  %2653 = vmatprep.mubr.msk.f32.mxu0 %vm267_vm4, %v259_v63  ;;  %v264_v3 = vsub.f32 %v2926_v59, %v260_v0 }
 0x24a   :  { %v266_v5 = vmul.f32 0.5, %v264_v3  ;;  %v265_v6 = vmul.f32 0.5, %v263_v1 }
 0x24c   :  { %2649 = vmatprep.subr.mxu0 %v266_v5 }
 0x24d   :  { %2650 = vmatpush3.msra.mxu0 %v266_v5 }
 0x24e   :  { %2651 = vmatprep.subr.mxu0 %v265_v6 }
 0x24f   :  { %2652 = vmatpush3.msra.mxu0 %v265_v6 }
 0x250   :  { %2654 = vmatmul.mubr.msk.f32.vlgmr.msra.gmra.mxu0 %vm267_vm4, %v260_v0 }
 0x251   :  { %2660 = vmatprep.mubr.msk.f32.mxu0 %vm267_vm4, %v265_v6 }
 0x310   :  { %v2655_v9 = vpop.f32.mrf.mxu0 }
 0x311   :  { %2656 = vmatprep.subr.mxu0 %v2655_v9 }
 0x312   :  { %v340_v10 = vpop.f32.mrf.mxu0  ;;  %2657 = vmatpush3.msra.mxu0 %v2655_v9 }
 0x313   :  { %2658 = vmatprep.subr.mxu0 %v340_v10  ;;  %2667 = vmatprep.mubr.msk.f32.mxu1 %vm267_vm4, %v340_v10 }
 0x314   :  { %2659 = vmatpush3.msra.mxu0 %v340_v10 }
 0x315   :  { %2661 = vmatmul.mubr.msk.f32.vlgmr.msra.gmra.mxu0 %vm267_vm4, %v266_v5  ;;  %2670 = vmatprep.subr.mxu0 %v266_v5 }
 0x316   :  { %2671 = vmatpush3.msra.mxu0 %v266_v5 }
 0x317   :  { %2672 = vmatprep.subr.mxu0 %v265_v6 }
 0x318   :  { %2673 = vmatpush3.msra.mxu0 %v265_v6 }
 0x3d5   :  { %v2662_v11 = vpop.f32.mrf.mxu0 }
 0x3d6   :  { %v431_v12 = vsub.f32 %v2926_v59, %v2662_v11 }
 0x3d7   :  { %v421_v14 = vpop.f32.mrf.mxu0 }
 0x3d8   :  { %v433_v15 = vmul.f32 0.5, %v431_v12  ;;  %v430_v16 = vsub.f32 %v2924_v58, %v421_v14 }
 0x3da   :  { %v432_v17 = vmul.f32 0.5, %v430_v16  ;;  %2663 = vmatprep.subr.mxu1 %v433_v15 }
 0x3db   :  { %2664 = vmatpush3.msra.mxu1 %v433_v15 }
 0x3dc   :  { %2665 = vmatprep.subr.mxu1 %v432_v17  ;;  %2674 = vmatprep.mubr.msk.f32.mxu0 %vm267_vm4, %v432_v17 }
 0x3dd   :  { %2666 = vmatpush3.msra.mxu1 %v432_v17  ;;  %2675 = vmatmul.mubr.msk.f32.vlgmr.msra.gmra.mxu0 %vm267_vm4, %v433_v15 }
 0x3de   :  { %2668 = vmatmul.mubr.msk.f32.vlgmr.msra.gmra.mxu1 %vm267_vm4, %v2655_v9 }
 0x49d   :  { %v2676_v18 = vpop.f32.mrf.mxu0 }
 0x49e   :  { %v2669_v19 = vpop.f32.mrf.mxu1 }
 0x49f   :  { %v587_v20 = vpop.f32.mrf.mxu0  ;;  %2677 = vmatprep.subr.mxu1 %v2669_v19 }
 0x4a0   :  { %v506_v21 = vpop.f32.mrf.mxu1  ;;  %2678 = vmatpush3.msra.mxu1 %v2669_v19  ;;  %2681 = vmatprep.mubr.msk.f32.mxu1 %vm267_vm4, %v587_v20 }
 0x4a1   :  { %2679 = vmatprep.subr.mxu1 %v506_v21  ;;  %2688 = vmatprep.mubr.msk.f32.mxu0 %vm267_vm4, %v506_v21 }
 0x4a2   :  { %2680 = vmatpush3.msra.mxu1 %v506_v21  ;;  %v1261_v21 = vand.u32 2147483648, %v2919_v53 }
 0x4a3   :  { %2682 = vmatmul.mubr.msk.f32.vlgmr.msra.gmra.mxu1 %vm267_vm4, %v2676_v18  ;;  %2691 = vmatprep.subr.mxu1 %v2676_v18 }
 0x4a4   :  { %2692 = vmatpush3.msra.mxu1 %v2676_v18  ;;  %v2832_v18 = vpop.eup %2831 }
 0x4a5   :  { %2693 = vmatprep.subr.mxu1 %v587_v20 }
 0x4a6   :  { %2694 = vmatpush3.msra.mxu1 %v587_v20 }
 0x563   :  { %v2683_v22 = vpop.f32.mrf.mxu1 }
 0x564   :  { %v678_v23 = vsub.f32 %v2926_v59, %v2683_v22 }
 0x565   :  { %v668_v24 = vpop.f32.mrf.mxu1 }
 0x566   :  { %v680_v25 = vmul.f32 0.5, %v678_v23  ;;  %v677_v26 = vsub.f32 %v2924_v58, %v668_v24 }
 0x568   :  { %v679_v27 = vmul.f32 0.5, %v677_v26  ;;  %2684 = vmatprep.subr.mxu0 %v680_v25 }
 0x569   :  { %2685 = vmatpush3.msra.mxu0 %v680_v25 }
 0x56a   :  { %2686 = vmatprep.subr.mxu0 %v679_v27  ;;  %2695 = vmatprep.mubr.msk.f32.mxu1 %vm267_vm4, %v679_v27 }
 0x56b   :  { %2687 = vmatpush3.msra.mxu0 %v679_v27  ;;  %2696 = vmatmul.mubr.msk.f32.vlgmr.msra.gmra.mxu1 %vm267_vm4, %v680_v25 }
 0x56c   :  { %2689 = vmatmul.mubr.msk.f32.vlgmr.msra.gmra.mxu0 %vm267_vm4, %v2669_v19  ;;  %v1257_v19 = vmul.f32 %v2832_v18, %v2919_v53 }
 0x56e   :  { %v1259_v20 = vsel %vm1258_vm5, %v2919_v53, %v1257_v19 }
 0x56f   :  { %v1262_v23 = vsel %vm1260_vm6, %v1261_v21, %v1259_v20 }
 0x62b   :  { %v2697_v28 = vpop.f32.mrf.mxu1 }
 0x62c   :  { %v2690_v29 = vpop.f32.mrf.mxu0 }
 0x62d   :  { %v834_v30 = vpop.f32.mrf.mxu1  ;;  %2698 = vmatprep.subr.mxu0 %v2690_v29 }
 0x62e   :  { %v753_v31 = vpop.f32.mrf.mxu0  ;;  %2699 = vmatpush3.msra.mxu0 %v2690_v29  ;;  %2702 = vmatprep.mubr.msk.f32.mxu0 %vm267_vm4, %v834_v30 }
 0x62f   :  { %2700 = vmatprep.subr.mxu0 %v753_v31  ;;  %2709 = vmatprep.mubr.msk.f32.mxu1 %vm267_vm4, %v753_v31 }
 0x630   :  { %2701 = vmatpush3.msra.mxu0 %v753_v31 }
 0x631   :  { %2703 = vmatmul.mubr.msk.f32.vlgmr.msra.gmra.mxu0 %vm267_vm4, %v2697_v28  ;;  %2712 = vmatprep.subr.mxu0 %v2697_v28 }
 0x632   :  { %2713 = vmatpush3.msra.mxu0 %v2697_v28 }
 0x633   :  { %2714 = vmatprep.subr.mxu0 %v834_v30 }
 0x634   :  { %2715 = vmatpush3.msra.mxu0 %v834_v30 }
 0x6f1   :  { %v2704_v32 = vpop.f32.mrf.mxu0 }
 0x6f2   :  { %v925_v33 = vsub.f32 %v2926_v59, %v2704_v32 }
 0x6f3   :  { %v915_v34 = vpop.f32.mrf.mxu0 }
 0x6f4   :  { %v927_v35 = vmul.f32 0.5, %v925_v33  ;;  %v924_v36 = vsub.f32 %v2924_v58, %v915_v34 }
 0x6f6   :  { %v926_v37 = vmul.f32 0.5, %v924_v36  ;;  %2705 = vmatprep.subr.mxu1 %v927_v35 }
 0x6f7   :  { %2706 = vmatpush3.msra.mxu1 %v927_v35 }
 0x6f8   :  { %2707 = vmatprep.subr.mxu1 %v926_v37  ;;  %2716 = vmatprep.mubr.msk.f32.mxu0 %vm267_vm4, %v926_v37 }
 0x6f9   :  { %2708 = vmatpush3.msra.mxu1 %v926_v37  ;;  %2717 = vmatmul.mubr.msk.f32.vlgmr.msra.gmra.mxu0 %vm267_vm4, %v927_v35 }
 0x6fa   :  { %2710 = vmatmul.mubr.msk.f32.vlgmr.msra.gmra.mxu1 %vm267_vm4, %v2690_v29 }
 0x7b9   :  { %v2718_v39 = vpop.f32.mrf.mxu0 }
 0x7ba   :  { %v2711_v40 = vpop.f32.mrf.mxu1 }
 0x7bb   :  { %v1081_v41 = vpop.f32.mrf.mxu0  ;;  %2719 = vmatprep.subr.mxu1 %v2711_v40 }
 0x7bc   :  { %v1000_v43 = vpop.f32.mrf.mxu1  ;;  %2720 = vmatpush3.msra.mxu1 %v2711_v40  ;;  %2723 = vmatprep.mubr.msk.f32.mxu1 %vm267_vm4, %v1081_v41 }
 0x7bd   :  { %2721 = vmatprep.subr.mxu1 %v1000_v43  ;;  %2730 = vmatprep.mubr.msk.f32.mxu0 %vm267_vm4, %v1000_v43 }
 0x7be   :  { %2722 = vmatpush3.msra.mxu1 %v1000_v43 }
 0x7bf   :  { %2724 = vmatmul.mubr.msk.f32.vlgmr.msra.gmra.mxu1 %vm267_vm4, %v2718_v39  ;;  %2525 = vmatprep.subr.msk.mxu1 %vm57_vm0, %v1270_v42 }
 0x7c0   :  { %2526 = vmatpush1.msk.msra.mxu1 %vm57_vm0, %v2524_v38  ;;  %1339 = vmatprep.mubr.f32.mxu1 %v2859_v2 }
 0x7c3   :  { %2527 = vmatmul.mubr.msk.f32.vlgmr.msra.gmra.mxu1 %vm50_vm1, %v2894_v4 }
 0x7c4   :  { %1345 = vmatprep.mubr.f32.mxu1 %v2859_v2 }
 0x7c7   :  { %2528 = vmatmul.mubr.msk.f32.gmra.mxu1 %vm50_vm1, %v2907_v7 }
 0x87f   :  { %v2725_v44 = vpop.f32.mrf.mxu1 }
 0x880   :  { %v1172_v45 = vsub.f32 %v2926_v59, %v2725_v44 }
 0x881   :  { %v1162_v46 = vpop.f32.mrf.mxu1 }
 0x882   :  { %v1174_v47 = vmul.f32 0.5, %v1172_v45  ;;  %v1171_v48 = vsub.f32 %v2924_v58, %v1162_v46 }
 0x883   :  { %v1341_v49 = vpop.f32.mrf.mxu1 }
 0x884   :  { %v1173_v50 = vmul.f32 0.5, %v1171_v48  ;;  %2726 = vmatprep.subr.mxu0 %v1174_v47  ;;  %v1342_v55 = vadd.f32 %v1341_v49, %v2914_v13 }
 0x885   :  { %2727 = vmatpush3.msra.mxu0 %v1174_v47  ;;  %v1343_v51 = vpop.f32.mrf.mxu1 }
 0x886   :  { %2728 = vmatprep.subr.mxu0 %v1173_v50  ;;  %v1344_v52 = vadd.f32 %v1343_v51, %v2914_v13  ;;  %v1352_v62 = vmax.f32 %v1342_v55, 0.0 }
 0x887   :  { %2729 = vmatpush3.msra.mxu0 %v1173_v50  ;;  %v1347_v4 = vpop.f32.mrf.mxu1 }
 0x888   :  { %v1348_v2 = vadd.f32 %v1347_v4, %v2911_v8  ;;  %2731 = vmatmul.mubr.msk.f32.vlgmr.msra.gmra.mxu0 %vm267_vm4, %v2711_v40  ;;  %v1353_v60 = vmax.f32 %v1344_v52, 0.0 }
 0x889   :  { %v1349_v7 = vpop.f32.mrf.mxu1 }
 0x88a   :  { %v1350_v54 = vadd.f32 %v1349_v7, %v2911_v8  ;;  %v1354_v56 = vmax.f32 %v1348_v2, 0.0  ;;  %v1360_v63 = vadd.f32 %v1353_v60, %v1352_v62 }
 0x88c   :  { %v1355_v57 = vmax.f32 %v1350_v54, 0.0 }
 0x88e   :  { %v1363_v61 = vadd.f32 %v1355_v57, %v1354_v56 }
 0x890   :  { %1364 = vadd.xlane.f32.xlu1 %v1363_v61 }
 0x894   :  { %1361 = vadd.xlane.f32.xlu1 %v1360_v63 }
 0x919   :  { %v1365_v0 = vpop.xlane.xlu1 %1364 }
 0x91a   :  { %v1367_v1 = vmul.f32 0.00390625, %v1365_v0 }
 0x91c   :  { %v1370_v3 = vsub.f32 %v1354_v56, %v1367_v1  ;;  %v1371_v5 = vsub.f32 %v1355_v57, %v1367_v1 }
 0x91d   :  { %v1362_v6 = vpop.xlane.xlu1 %1361 }
 0x91e   :  { %v1366_v9 = vmul.f32 0.00390625, %v1362_v6  ;;  %1404 = vmatprep.subr.mxu0 %v1371_v5  ;;  %v1455_v12 = vmul.f32 %v1370_v3, %v1370_v3  ;;  %v1456_v15 = vmul.f32 %v1371_v5, %v1371_v5 }
 0x91f   :  { %1405 = vmatpush1.xpose.msra.mxu0 %v1370_v3 }
 0x920   :  { %v1368_v10 = vsub.f32 %v1352_v62, %v1366_v9  ;;  %v1369_v8 = vsub.f32 %v1353_v60, %v1366_v9 }
 0x922   :  { %v1453_v11 = vmul.f32 %v1368_v10, %v1368_v10  ;;  %v1454_v13 = vmul.f32 %v1369_v8, %v1369_v8  ;;  %1406 = vmatprep.subr.mxu0 %v1369_v8  ;;  %1440 = vmatprep.mubr.f32.mxu0 %v1369_v8 }
 0x923   :  { %1407 = vmatpush1.xpose.msra.mxu0 %v1368_v10 }
 0x924   :  { %v1457_v14 = vadd.f32 %v1454_v13, %v1453_v11 }
 0x926   :  { %1441 = vmatmul.mubr.f32.vlgmr.msra.gmra.mxu0 %v1368_v10  ;;  %v1458_v16 = vadd.f32 %v1457_v14, %v1455_v12 }
 0x927   :  { %1445 = vmatprep.mubr.f32.mxu0 %v1371_v5 }
 0x928   :  { %v1459_v17 = vadd.f32 %v1458_v16, %v1456_v15 }
 0x92a   :  { %1460 = vadd.xlane.f32.xlu1 %v1459_v17  ;;  %1446 = vmatmul.mubr.f32.gmra.mxu0 %v1370_v3 }
 0x948   :  { %v2732_v22 = vpop.f32.mrf.mxu0 }
 0x949   :  { %v1264_v24 = vmul.f32 %v2732_v22, %v1262_v23 }
 0x94a   :  { %v1247_v25 = vpop.f32.mrf.mxu0 }
 0x94b   :  { %1266 = vst.msk [vmem:[#allocation2 + $0x8] sm:$0xff] %vm267_vm4, %v1264_v24  ;;  %v1263_v26 = vmul.f32 %v1262_v23, %v1247_v25 }
 0x94d   :  { %1265 = vst.msk [vmem:[#allocation2] sm:$0xff] %vm267_vm4, %v1263_v26 }
 0x9b3   :  { %v1461_v27 = vpop.xlane.xlu1 %1460 }
 0x9b4   :  { %v1462_v28 = vrot.slane %v1461_v27, 4 }
 0x9b6   :  { %v1463_v29 = vadd.f32 %v1462_v28, %v1461_v27 }
 0x9b8   :  { %v1464_v30 = vrot.slane %v1463_v29, 2 }
 0x9ba   :  { %v1465_v31 = vadd.f32 %v1464_v30, %v1463_v29 }
 0x9bc   :  { %v1466_v32 = vrot.slane %v1465_v31, 1 }
 0x9be   :  { %v1467_v33 = vadd.f32 %v1466_v32, %v1465_v31 }
 0x9c0   :  { %2819 = vpush %v1467_v33 }
 0x9e6   :  { %v1442_v34 = vpop.f32.mrf.mxu0 }
 0x9e7   :  { %v1451_v39 = vmul.f32 0.00390625, %v1442_v34 }
 0x9e8   :  { %v1444_v35 = vpop.f32.mrf.mxu0 }
 0x9ea   :  { %v1447_v53 = vpop.f32.mrf.mxu0 }
 0x9eb   :  { %v1452_v40 = vmul.f32 0.00390625, %v1447_v53 }
 0x9ec   :  { %v1449_v36 = vpop.f32.mrf.mxu0 }
 0x9f1   :  { %s2820_s0 = spop %2819 }
 0x9f2   :  { %v1469_v37 = vstv %s2820_s0 }
 0x9f3   :  { %v2985_v38 = vmul.f32 0.00390625, %v1469_v37 }
 0x9f5   :  { %2833 = vrcp.f32 %v2985_v38  ;;  %vm2468_vm7 = vcmp.eq.f32.partialorder %v2985_v38, inf  ;;  %v2471_v27 = vand.u32 2147483648, %v2985_v38  ;;  %vm2470_vm8 = vcmp.eq.f32.partialorder %v2985_v38, 0.0 }
 0x9f6   :  { %2835 = vrsqrt.f32 %v2985_v38 }
 0xa02   :  { %v2834_v41 = vpop.eup %2833 }
 0xa03   :  { %v1472_v42 = vmul.f32 %v2834_v41, %v1451_v39  ;;  %v1473_v43 = vmul.f32 %v2834_v41, %v1452_v40  ;;  %v2836_v25 = vpop.eup %2835 }
 0xa04   :  { %v2467_v26 = vmul.f32 %v2836_v25, %v2985_v38 }
 0xa05   :  { %v1474_v44 = vsub.f32 %v2924_v58, %v1472_v42  ;;  %2737 = vmatprep.mubr.msk.f32.mxu1 %vm267_vm4, %v1472_v42  ;;  %v1475_v45 = vsub.f32 %v2926_v59, %v1473_v43 }
 0xa07   :  { %v1477_v46 = vmul.f32 0.5, %v1475_v45  ;;  %v1476_v47 = vmul.f32 0.5, %v1474_v44 }
 0xa09   :  { %2733 = vmatprep.subr.mxu1 %v1477_v46 }
 0xa0a   :  { %2734 = vmatpush3.msra.mxu1 %v1477_v46 }
 0xa0b   :  { %2735 = vmatprep.subr.mxu1 %v1476_v47 }
 0xa0c   :  { %2736 = vmatpush3.msra.mxu1 %v1476_v47 }
 0xa0d   :  { %2738 = vmatmul.mubr.msk.f32.vlgmr.msra.gmra.mxu1 %vm267_vm4, %v1473_v43 }
 0xa0e   :  { %2744 = vmatprep.mubr.msk.f32.mxu1 %vm267_vm4, %v1476_v47 }
 0xacd   :  { %v2739_v48 = vpop.f32.mrf.mxu1 }
 0xace   :  { %2740 = vmatprep.subr.mxu1 %v2739_v48 }
 0xacf   :  { %v1550_v49 = vpop.f32.mrf.mxu1  ;;  %2741 = vmatpush3.msra.mxu1 %v2739_v48 }
 0xad0   :  { %2742 = vmatprep.subr.mxu1 %v1550_v49  ;;  %2751 = vmatprep.mubr.msk.f32.mxu0 %vm267_vm4, %v1550_v49 }
 0xad1   :  { %2743 = vmatpush3.msra.mxu1 %v1550_v49 }
 0xad2   :  { %2745 = vmatmul.mubr.msk.f32.vlgmr.msra.gmra.mxu1 %vm267_vm4, %v1477_v46  ;;  %2754 = vmatprep.subr.mxu1 %v1477_v46 }
 0xad3   :  { %2755 = vmatpush3.msra.mxu1 %v1477_v46 }
 0xad4   :  { %2756 = vmatprep.subr.mxu1 %v1476_v47 }
 0xad5   :  { %2757 = vmatpush3.msra.mxu1 %v1476_v47 }
 0xb92   :  { %v2746_v50 = vpop.f32.mrf.mxu1 }
 0xb93   :  { %v1641_v51 = vsub.f32 %v2926_v59, %v2746_v50 }
 0xb94   :  { %v1631_v4 = vpop.f32.mrf.mxu1 }
 0xb95   :  { %v1643_v2 = vmul.f32 0.5, %v1641_v51  ;;  %v1640_v7 = vsub.f32 %v2924_v58, %v1631_v4 }
 0xb97   :  { %v1642_v52 = vmul.f32 0.5, %v1640_v7  ;;  %2747 = vmatprep.subr.mxu0 %v1643_v2 }
 0xb98   :  { %2748 = vmatpush3.msra.mxu0 %v1643_v2 }
 0xb99   :  { %2749 = vmatprep.subr.mxu0 %v1642_v52  ;;  %2758 = vmatprep.mubr.msk.f32.mxu1 %vm267_vm4, %v1642_v52 }
 0xb9a   :  { %2750 = vmatpush3.msra.mxu0 %v1642_v52  ;;  %2759 = vmatmul.mubr.msk.f32.vlgmr.msra.gmra.mxu1 %vm267_vm4, %v1643_v2 }
 0xb9b   :  { %2752 = vmatmul.mubr.msk.f32.vlgmr.msra.gmra.mxu0 %vm267_vm4, %v2739_v48 }
 0xc5a   :  { %v2760_v54 = vpop.f32.mrf.mxu1 }
 0xc5b   :  { %v2753_v55 = vpop.f32.mrf.mxu0 }
 0xc5c   :  { %v1797_v56 = vpop.f32.mrf.mxu1  ;;  %2761 = vmatprep.subr.mxu0 %v2753_v55 }
 0xc5d   :  { %v1716_v57 = vpop.f32.mrf.mxu0  ;;  %2762 = vmatpush3.msra.mxu0 %v2753_v55  ;;  %2765 = vmatprep.mubr.msk.f32.mxu0 %vm267_vm4, %v1797_v56 }
 0xc5e   :  { %2763 = vmatprep.subr.mxu0 %v1716_v57  ;;  %2772 = vmatprep.mubr.msk.f32.mxu1 %vm267_vm4, %v1716_v57 }
 0xc5f   :  { %2764 = vmatpush3.msra.mxu0 %v1716_v57 }
 0xc60   :  { %2766 = vmatmul.mubr.msk.f32.vlgmr.msra.gmra.mxu0 %vm267_vm4, %v2760_v54  ;;  %2775 = vmatprep.subr.mxu0 %v2760_v54 }
 0xc61   :  { %2776 = vmatpush3.msra.mxu0 %v2760_v54 }
 0xc62   :  { %2777 = vmatprep.subr.mxu0 %v1797_v56 }
 0xc63   :  { %2778 = vmatpush3.msra.mxu0 %v1797_v56 }
 0xd20   :  { %v2767_v60 = vpop.f32.mrf.mxu0 }
 0xd21   :  { %v1888_v61 = vsub.f32 %v2926_v59, %v2767_v60 }
 0xd22   :  { %v1878_v62 = vpop.f32.mrf.mxu0 }
 0xd23   :  { %v1890_v63 = vmul.f32 0.5, %v1888_v61  ;;  %v1887_v0 = vsub.f32 %v2924_v58, %v1878_v62 }
 0xd25   :  { %v1889_v1 = vmul.f32 0.5, %v1887_v0  ;;  %2768 = vmatprep.subr.mxu1 %v1890_v63 }
 0xd26   :  { %2769 = vmatpush3.msra.mxu1 %v1890_v63 }
 0xd27   :  { %2770 = vmatprep.subr.mxu1 %v1889_v1  ;;  %2779 = vmatprep.mubr.msk.f32.mxu0 %vm267_vm4, %v1889_v1 }
 0xd28   :  { %2771 = vmatpush3.msra.mxu1 %v1889_v1  ;;  %2780 = vmatmul.mubr.msk.f32.vlgmr.msra.gmra.mxu0 %vm267_vm4, %v1890_v63 }
 0xd29   :  { %2773 = vmatmul.mubr.msk.f32.vlgmr.msra.gmra.mxu1 %vm267_vm4, %v2753_v55 }
 0xde8   :  { %v2781_v3 = vpop.f32.mrf.mxu0 }
 0xde9   :  { %v2774_v5 = vpop.f32.mrf.mxu1 }
 0xdea   :  { %v2044_v6 = vpop.f32.mrf.mxu0  ;;  %2782 = vmatprep.subr.mxu1 %v2774_v5 }
 0xdeb   :  { %v1963_v9 = vpop.f32.mrf.mxu1  ;;  %2783 = vmatpush3.msra.mxu1 %v2774_v5  ;;  %2786 = vmatprep.mubr.msk.f32.mxu1 %vm267_vm4, %v2044_v6 }
 0xdec   :  { %2784 = vmatprep.subr.mxu1 %v1963_v9  ;;  %2793 = vmatprep.mubr.msk.f32.mxu0 %vm267_vm4, %v1963_v9 }
 0xded   :  { %2785 = vmatpush3.msra.mxu1 %v1963_v9 }
 0xdee   :  { %2787 = vmatmul.mubr.msk.f32.vlgmr.msra.gmra.mxu1 %vm267_vm4, %v2781_v3  ;;  %2796 = vmatprep.subr.mxu1 %v2781_v3 }
 0xdef   :  { %2797 = vmatpush3.msra.mxu1 %v2781_v3 }
 0xdf0   :  { %2798 = vmatprep.subr.mxu1 %v2044_v6 }
 0xdf1   :  { %2799 = vmatpush3.msra.mxu1 %v2044_v6 }
 0xeae   :  { %v2788_v10 = vpop.f32.mrf.mxu1 }
 0xeaf   :  { %v2135_v8 = vsub.f32 %v2926_v59, %v2788_v10 }
 0xeb0   :  { %v2125_v11 = vpop.f32.mrf.mxu1 }
 0xeb1   :  { %v2137_v13 = vmul.f32 0.5, %v2135_v8  ;;  %v2134_v12 = vsub.f32 %v2924_v58, %v2125_v11 }
 0xeb3   :  { %v2136_v14 = vmul.f32 0.5, %v2134_v12  ;;  %2789 = vmatprep.subr.mxu0 %v2137_v13 }
 0xeb4   :  { %2790 = vmatpush3.msra.mxu0 %v2137_v13 }
 0xeb5   :  { %2791 = vmatprep.subr.mxu0 %v2136_v14  ;;  %2800 = vmatprep.mubr.msk.f32.mxu1 %vm267_vm4, %v2136_v14 }
 0xeb6   :  { %2792 = vmatpush3.msra.mxu0 %v2136_v14  ;;  %2801 = vmatmul.mubr.msk.f32.vlgmr.msra.gmra.mxu1 %vm267_vm4, %v2137_v13 }
 0xeb7   :  { %2794 = vmatmul.mubr.msk.f32.vlgmr.msra.gmra.mxu0 %vm267_vm4, %v2774_v5 }
 0xf76   :  { %v2802_v15 = vpop.f32.mrf.mxu1 }
 0xf77   :  { %v2795_v16 = vpop.f32.mrf.mxu0 }
 0xf78   :  { %v2291_v17 = vpop.f32.mrf.mxu1  ;;  %2803 = vmatprep.subr.mxu0 %v2795_v16 }
 0xf79   :  { %v2210_v18 = vpop.f32.mrf.mxu0  ;;  %2804 = vmatpush3.msra.mxu0 %v2795_v16  ;;  %2807 = vmatprep.mubr.msk.f32.mxu0 %vm267_vm4, %v2291_v17 }
 0xf7a   :  { %2805 = vmatprep.subr.mxu0 %v2210_v18  ;;  %2814 = vmatprep.mubr.msk.f32.mxu1 %vm267_vm4, %v2210_v18 }
 0xf7b   :  { %2806 = vmatpush3.msra.mxu0 %v2210_v18 }
 0xf7c   :  { %2808 = vmatmul.mubr.msk.f32.vlgmr.msra.gmra.mxu0 %vm267_vm4, %v2802_v15 }
0x103c   :  { %v2809_v19 = vpop.f32.mrf.mxu0 }
0x103d   :  { %v2382_v20 = vsub.f32 %v2926_v59, %v2809_v19  ;;  %v2469_v59 = vsel %vm2468_vm7, %v2985_v38, %v2467_v26 }
0x103e   :  { %v2372_v21 = vpop.f32.mrf.mxu0  ;;  %v2472_v28 = vsel %vm2470_vm8, %v2471_v27, %v2469_v59 }
0x103f   :  { %v2384_v22 = vmul.f32 0.5, %v2382_v20  ;;  %v2381_v23 = vsub.f32 %v2924_v58, %v2372_v21 }
0x1041   :  { %v2383_v24 = vmul.f32 0.5, %v2381_v23  ;;  %2810 = vmatprep.subr.mxu1 %v2384_v22 }
0x1042   :  { %2811 = vmatpush3.msra.mxu1 %v2384_v22 }
0x1043   :  { %2812 = vmatprep.subr.mxu1 %v2383_v24 }
0x1044   :  { %2813 = vmatpush3.msra.mxu1 %v2383_v24 }
0x1045   :  { %2815 = vmatmul.mubr.msk.f32.vlgmr.msra.gmra.mxu1 %vm267_vm4, %v2795_v16 }
0x1105   :  { %v2816_v58 = vpop.f32.mrf.mxu1 }
0x1106   :  { %v2474_v29 = vmul.f32 %v2816_v58, %v2472_v28 }
0x1107   :  { %v2457_v30 = vpop.f32.mrf.mxu1 }
0x1108   :  { %2477 = vst.msk [vmem:[#allocation2 + $0x18] sm:$0xff] %vm267_vm4, %v2474_v29  ;;  %v2473_v31 = vmul.f32 %v2472_v28, %v2457_v30 }
0x110a   :  { %2476 = vst.msk [vmem:[#allocation2 + $0x10] sm:$0xff] %vm267_vm4, %v2473_v31 }
0x110b   :  { %2848 = shalt.err (!%p2845_p4)
}
0x110c   :  { %s2862_s26 = smov 128   ;;  %s2863_s27 = smov 8  }
0x110d   :  { %2489 = dma.vmem_to_hbm [thread:$0]  %s2484_s24, 512, %s3036_s3, [#allocation3], %s2862_s26, %s2862_s26, %s2863_s27  }
0x110e   :  { %2857 = dma.done.wait [#allocation3], 512  }
0x110f   :  { %2858 = vsyncadd [#allocation3], 4294966784 }
0x1110   :  { %2493 = vsyncpa [#allocation3], 1 }

</bundles_post_ra>
